<compile_context>
chip_gen: v5e
topology: v5e:2x2
jax: 0.10.0
libtpu: 0.0.40
codegen_flags: <defaults>
</compile_context>

<pallas_src>
import functools

import jax
import jax.numpy as jnp
from jax.experimental import pallas as pl
from jax.experimental.pallas import tpu as pltpu

_LANE = 128


def _round_up(x, m):
    return ((x + m - 1) // m) * m


def _vmem_capacity_bytes():
    try:
        return int(pltpu.get_tpu_info().vmem_capacity_bytes)
    except Exception:
        return 64 << 20          # conservative fallback (v7x per-TC VMEM)


def _pick_tile(n_pad, max_units, prefer_split=False):
    """Largest multiple of 128 dividing n_pad, capped at 128*max_units.

    prefer_split additionally caps it so the row axis gets >=2 tiles when
    possible (lets the 'parallel' row axis shard across v7x's two TensorCores).
    """
    m = n_pad // _LANE
    cap = min(m, max_units)
    if prefer_split and m >= 2:
        cap = min(cap, m // 2)
    best = 1
    for d in range(1, cap + 1):
        if m % d == 0:
            best = d
    return _LANE * best


# -----------------------------------------------------------------------------
# Kernel 1: H = (X * mask?) @ W   (feature transform, hoisted out of the SpMM)
# -----------------------------------------------------------------------------
def _xw_kernel(x_ref, w_ref, *rest, has_mask):
    if has_mask:
        mask_ref, out_ref = rest
    else:
        (out_ref,) = rest
    x = x_ref[...]                       # bf16, no f32 round trip
    if has_mask:
        x = x * mask_ref[...]            # inverted-dropout scale {0,2}, exact in bf16
    out_ref[...] = jnp.dot(x, w_ref[...],
                           preferred_element_type=jnp.float32).astype(out_ref.dtype)


def _xw(x, w, *, tr, mask=None, out_dtype=jnp.bfloat16):
    n_pad, c_x = x.shape
    c_out = w.shape[1]
    in_specs = [pl.BlockSpec((tr, c_x), lambda i: (i, 0)),
                pl.BlockSpec((c_x, c_out), lambda i: (0, 0))]
    args = [x, w]
    if mask is not None:
        in_specs.append(pl.BlockSpec((tr, c_x), lambda i: (i, 0)))
        args.append(mask)
    kernel = functools.partial(_xw_kernel, has_mask=mask is not None)
    return pl.pallas_call(
        kernel,
        out_shape=jax.ShapeDtypeStruct((n_pad, c_out), out_dtype),
        grid=(n_pad // tr,),
        in_specs=in_specs,
        out_specs=pl.BlockSpec((tr, c_out), lambda i: (i, 0)),
        compiler_params=pltpu.CompilerParams(dimension_semantics=("parallel",)),
    )(*args)


# -----------------------------------------------------------------------------
# Kernel 2: out = A_hat @ H + b   (tiled SpMM, H slab VMEM-resident)
# -----------------------------------------------------------------------------
def _spmm_kernel(a_ref, h_ref, b_ref, out_ref, *maybe_acc, tk):
    k = pl.program_id(1)
    acc_ref = maybe_acc[0] if maybe_acc else out_ref   # f32 output: accumulate in place

    @pl.when(k == 0)
    def _init():
        acc_ref[...] = jnp.zeros_like(acc_ref)

    kk = pl.multiple_of(k * tk, tk)
    acc_ref[...] += jnp.dot(a_ref[...], h_ref[pl.ds(kk, tk), :],
                            preferred_element_type=jnp.float32)

    @pl.when(k == pl.num_programs(1) - 1)
    def _finalize():
        if maybe_acc:
            out_ref[...] = (acc_ref[...] + b_ref[...]).astype(out_ref.dtype)
        else:
            out_ref[...] += b_ref[...]


def _spmm(a_hat, h, b, *, tm, tk, out_dtype, vmem_cap):
    n_pad = a_hat.shape[0]
    c_out = h.shape[1]
    grid = (n_pad // tm, n_pad // tk)
    use_scratch = jnp.dtype(out_dtype) != jnp.dtype(jnp.float32)
    scratch = [pltpu.VMEM((tm, c_out), jnp.float32)] if use_scratch else []

    est = (2 * tm * tk * 2            # A tiles (bf16, double-buffered)
           + 2 * n_pad * c_out * 2    # resident H slab (allow 2 buffers)
           + 2 * tm * c_out * 4       # output blocks
           + tm * c_out * 4           # accumulator scratch
           + (2 << 20))
    vmem_limit = int(min(max(est * 5 // 4, 16 << 20), int(0.75 * vmem_cap)))

    flops = 2 * n_pad * n_pad * c_out
    bytes_accessed = (a_hat.size * 2 + h.size * 2
                      + n_pad * c_out * jnp.dtype(out_dtype).itemsize)
    return pl.pallas_call(
        functools.partial(_spmm_kernel, tk=tk),
        out_shape=jax.ShapeDtypeStruct((n_pad, c_out), out_dtype),
        grid=grid,
        in_specs=[pl.BlockSpec((tm, tk), lambda i, k: (i, k)),        # A tile
                  pl.BlockSpec((n_pad, c_out), lambda i, k: (0, 0)),  # H resident
                  pl.BlockSpec((1, c_out), lambda i, k: (0, 0))],     # bias
        out_specs=pl.BlockSpec((tm, c_out), lambda i, k: (i, 0)),
        scratch_shapes=scratch,
        compiler_params=pltpu.CompilerParams(
            dimension_semantics=("parallel", "arbitrary"),
            vmem_limit_bytes=vmem_limit),
        cost_estimate=pl.CostEstimate(flops=int(flops), transcendentals=0,
                                      bytes_accessed=int(bytes_accessed)),
    )(a_hat, h, b)


# -----------------------------------------------------------------------------
# Kernel 3 (fused path): all three GCN layers with A_hat resident in VMEM.
#   grid = (3,): layer axis. A_hat is DMA'd once at layer 0; intermediate
#   activations (bf16) and H live in VMEM scratch; only the final layer writes
#   the f32 output slab.
# -----------------------------------------------------------------------------
def _fused_kernel(a_hbm, x_ref, mask_ref, w_ref, b_ref, out_ref,
                  a_vmem, act_ref, h_ref, *, n_panels, tm_panel):
    layer = pl.program_id(0)
    last = pl.num_programs(0) - 1

    @pl.when(layer == 0)
    def _init():
        pltpu.sync_copy(a_hbm, a_vmem)                    # A_hat -> VMEM, once
        act_ref[...] = x_ref[...] * mask_ref[...]         # dropout on layer-1 input

    # H = act @ W[layer]  (bf16 operands, f32 MXU accumulation)
    h_ref[...] = jnp.dot(act_ref[...], w_ref[...],
                         preferred_element_type=jnp.float32).astype(jnp.bfloat16)

    hv = h_ref[...]
    bias = b_ref[...]                                     # (1, w) f32
    for p in range(n_panels):
        rows = pl.ds(p * tm_panel, tm_panel)
        acc = jnp.dot(a_vmem[rows, :], hv,
                      preferred_element_type=jnp.float32) + bias

        @pl.when(layer != last)
        def _store_act(acc=acc, rows=rows):
            act_ref[rows, :] = acc.astype(jnp.bfloat16)

        @pl.when(layer == last)
        def _store_out(acc=acc, rows=rows):
            out_ref[rows, :] = acc


def _fused_vmem_estimate(n_pad, w, tm_panel):
    act = n_pad * w
    return (2 * n_pad * n_pad              # resident A (bf16)
            + 8 * act                      # x + mask inputs (bf16, 2 buffers each)
            + 4 * act                      # act + h scratch (bf16)
            + 4 * act                      # f32 output slab
            + 2 * tm_panel * n_pad         # A row-panel operand
            + 8 * act                      # large value temporaries
            + (4 << 20))                   # weights, biases, compiler scratch


def _fused_forward(a_p, x_p, mask_p, ws, bs, *, n_pad, w, vmem_cap):
    tm_panel = _pick_tile(n_pad, 4)                       # <=512, divides n_pad
    n_panels = n_pad // tm_panel
    est = _fused_vmem_estimate(n_pad, w, tm_panel)
    vmem_limit = int(min(max(est * 5 // 4, 16 << 20), int(0.75 * vmem_cap)))

    flops = 3 * (2 * n_pad * w * w + 2 * n_pad * n_pad * w)
    bytes_accessed = a_p.size * 2 + 2 * x_p.size * 2 + n_pad * w * 4 + ws.size * 2
    return pl.pallas_call(
        functools.partial(_fused_kernel, n_panels=n_panels, tm_panel=tm_panel),
        out_shape=jax.ShapeDtypeStruct((n_pad, w), jnp.float32),
        grid=(3,),
        in_specs=[
            pl.BlockSpec(memory_space=pl.ANY),                 # A_hat stays in HBM
            pl.BlockSpec((n_pad, w), lambda l: (0, 0)),        # x (resident)
            pl.BlockSpec((n_pad, w), lambda l: (0, 0)),        # dropout mask
            pl.BlockSpec((None, w, w), lambda l: (l, 0, 0)),   # W[layer]
            pl.BlockSpec((None, 1, w), lambda l: (l, 0, 0)),   # b[layer]
        ],
        out_specs=pl.BlockSpec((n_pad, w), lambda l: (0, 0)),
        scratch_shapes=[
            pltpu.VMEM((n_pad, n_pad), jnp.bfloat16),          # resident A
            pltpu.VMEM((n_pad, w), jnp.bfloat16),              # activation
            pltpu.VMEM((n_pad, w), jnp.bfloat16),              # H = act @ W
        ],
        compiler_params=pltpu.CompilerParams(
            dimension_semantics=("arbitrary",),
            vmem_limit_bytes=vmem_limit),
        cost_estimate=pl.CostEstimate(flops=int(flops), transcendentals=0,
                                      bytes_accessed=int(bytes_accessed)),
    )(a_p, x_p, mask_p, ws, bs)


# -----------------------------------------------------------------------------
# Graph glue (plain JAX): GCN-normalized dense adjacency.
# -----------------------------------------------------------------------------
def gcn_norm_adjacency(edge_index, num_nodes, dtype=jnp.float32):
    """Dense A_hat = D^{-1/2} (A + remaining self loops) D^{-1/2} (GCNConv norm).

    Duplicate edges accumulate (scatter-add, matching PyG degree counting);
    unit-weight self-loops are added only to nodes that have none
    (add_remaining_self_loops semantics: existing self-loop weights are kept).
    """
    src, dst = edge_index[0], edge_index[1]
    a = jnp.zeros((num_nodes, num_nodes), jnp.float32).at[dst, src].add(1.0)
    diag = jnp.diagonal(a)
    a = a + jnp.diag(jnp.where(diag > 0, 0.0, 1.0))
    deg = a.sum(axis=1)
    d_inv_sqrt = jax.lax.rsqrt(jnp.maximum(deg, 1e-12))
    return (d_inv_sqrt[:, None] * a * d_inv_sqrt[None, :]).astype(dtype)


def _dropout_scale(key, n, c):
    keep = jax.random.bernoulli(key, 0.5, (n, c))
    return jnp.where(keep, 2.0, 0.0).astype(jnp.float32)


# -----------------------------------------------------------------------------
# Full Discriminator forward.
# -----------------------------------------------------------------------------
def discriminator_forward(x, edge_index, params, *, dropout_key=None,
                          a_hat=None, fuse=None):
    n, c_in = x.shape
    hidden = params["w1"].shape[1]
    out_ch = params["w2"].shape[1]

    vmem_cap = _vmem_capacity_bytes()
    n_pad = max(_round_up(n, _LANE), _LANE)
    w = max(_LANE, _round_up(max(c_in, hidden, out_ch, 1), _LANE))  # uniform lane-dense width

    # --- normalized adjacency (bf16, zero padded to n_pad) --------------------
    if a_hat is None:
        a_hat = gcn_norm_adjacency(edge_index, n)    # A_hat is static per graph (cached=True)
    a_p = jnp.zeros((n_pad, n_pad), jnp.bfloat16).at[:n, :n].set(
        a_hat.astype(jnp.bfloat16))

    # --- padded, lane-dense parameters (bf16 MXU operands, f32 biases) --------
    def pad2(m, rows, cols, dtype):
        out = jnp.zeros((rows, cols), dtype)
        return out.at[:m.shape[0], :m.shape[1]].set(m.astype(dtype))

    ws = jnp.stack([pad2(params["w1"], w, w, jnp.bfloat16),
                    pad2(params["w2"], w, w, jnp.bfloat16),
                    pad2(params["w3"], w, w, jnp.bfloat16)])          # (3, w, w)
    bs = jnp.stack([pad2(params["b1"].reshape(1, -1), 1, w, jnp.float32),
                    pad2(params["b2"].reshape(1, -1), 1, w, jnp.float32),
                    pad2(params["b3"].reshape(1, -1), 1, w, jnp.float32)])  # (3, 1, w)

    x_p = pad2(x, n_pad, w, jnp.bfloat16)

    # --- dropout(p=0.5, train=True): host-generated bf16 {0,2} scale ----------
    # TODO(synk): switch to in-kernel pltpu.prng_random_bits when CPU/interpret
    # compatibility is not required (the hardware PRNG has no CPU lowering).
    if dropout_key is None:
        dropout_key = jax.random.PRNGKey(0)
    scale = _dropout_scale(dropout_key, n, c_in)
    mask_p = pad2(scale, n_pad, w, jnp.bfloat16)

    # --- choose fused (resident A) vs streaming path ---------------------------
    if fuse is None:
        est = _fused_vmem_estimate(n_pad, w, _pick_tile(n_pad, 4))
        fuse = est <= int(0.6 * vmem_cap)

    if fuse:
        y = _fused_forward(a_p, x_p, mask_p, ws, bs,
                           n_pad=n_pad, w=w, vmem_cap=vmem_cap)
        return y[:n, :1]

    # --- streaming path: per-layer hoisted X@W + A-streaming SpMM -------------
    tk = _pick_tile(n_pad, 8)                                  # up to 1024
    tm = _pick_tile(n_pad, 8, prefer_split=(n_pad <= 2048))    # >=2 row tiles when small

    h1 = _xw(x_p, ws[0], tr=tm, mask=mask_p)
    y1 = _spmm(a_p, h1, bs[0], tm=tm, tk=tk, out_dtype=jnp.bfloat16, vmem_cap=vmem_cap)
    h2 = _xw(y1, ws[1], tr=tm)
    y2 = _spmm(a_p, h2, bs[1], tm=tm, tk=tk, out_dtype=jnp.bfloat16, vmem_cap=vmem_cap)
    h3 = _xw(y2, ws[2], tr=tm)
    y3 = _spmm(a_p, h3, bs[2], tm=tm, tk=tk, out_dtype=jnp.float32, vmem_cap=vmem_cap)
    return y3[:n, :1]


# -----------------------------------------------------------------------------
# Pure-JAX f32 reference (for correctness check) and parameter init.
# -----------------------------------------------------------------------------
def _reference_forward(x, edge_index, params, dropout_key):
    n = x.shape[0]
    a = gcn_norm_adjacency(edge_index, n)
    h = x * _dropout_scale(dropout_key, *x.shape)
    h = a @ (h @ params["w1"]) + params["b1"]
    h = a @ (h @ params["w2"]) + params["b2"]
    h = a @ (h @ params["w3"]) + params["b3"]
    return h


def init_params(key, input_channels, hidden_channels, output_channels):
    """Deterministic glorot-style init (stand-in for init_weights); biases zero."""
    k1, k2, k3 = jax.random.split(key, 3)

    def glorot(k, fan_in, fan_out):
        s = jnp.sqrt(2.0 / (fan_in + fan_out))
        return jax.random.normal(k, (fan_in, fan_out), jnp.float32) * s

    return {
        "w1": glorot(k1, input_channels, hidden_channels),
        "b1": jnp.zeros((hidden_channels,), jnp.float32),
        "w2": glorot(k2, hidden_channels, output_channels),
        "b2": jnp.zeros((output_channels,), jnp.float32),
        "w3": glorot(k3, output_channels, 1),
        "b3": jnp.zeros((1,), jnp.float32),
    }


if __name__ == "__main__":
    # Small shapes consistent with the module: N nodes with C-dim features.
    N = 16                 # nodes
    C_IN = 4               # input_channels
    HIDDEN = 32            # hidden_channels (scaled down from 100)
    OUT_CH = 16            # output_channels (scaled down from 64)
    E = 32                 # edges

    key = jax.random.PRNGKey(0)
    k_x, k_e, k_p, k_d = jax.random.split(key, 4)

    x = jax.random.normal(k_x, (N, C_IN), jnp.float32)
    edge_index = jax.random.randint(k_e, (2, E), 0, N, dtype=jnp.int32)
    params = init_params(k_p, C_IN, HIDDEN, OUT_CH)

    # Fused (resident-A) path — default for small graphs.
    out_fused = discriminator_forward(x, edge_index, params, dropout_key=k_d)
    # Streaming (A-tiled) path — forced, so both kernel families are exercised.
    out_stream = discriminator_forward(x, edge_index, params, dropout_key=k_d,
                                       fuse=False)
    out_fused, out_stream = jax.block_until_ready((out_fused, out_stream))

    ref = _reference_forward(x, edge_index, params, k_d)[:, :1]
    tol = 0.1 * (1.0 + float(jnp.max(jnp.abs(ref))))

    for out in (out_fused, out_stream):
        assert out.shape == (N, 1) and out.dtype == jnp.float32
        assert bool(jnp.all(jnp.isfinite(out)))
        err = float(jnp.max(jnp.abs(out - ref)))
        assert err <= tol, (err, tol)

    print("KERNEL_OK")
</pallas_src>

<mosaic_0001>
module attributes {stable_mosaic.version = 11 : i64} {
  func.func @_fused_kernel(%arg0: i32, %arg1: memref<128x128xbf16, #tpu.memory_space<any>>, %arg2: memref<128x128xbf16, #tpu.memory_space<vmem>>, %arg3: memref<128x128xbf16, #tpu.memory_space<vmem>>, %arg4: memref<1x128x128xbf16, #tpu.memory_space<vmem>>, %arg5: memref<1x1x128xf32, #tpu.memory_space<vmem>>, %arg6: memref<128x128xf32, #tpu.memory_space<vmem>>, %arg7: memref<128x128xbf16, #tpu.memory_space<vmem>>, %arg8: memref<128x128xbf16, #tpu.memory_space<vmem>>, %arg9: memref<128x128xbf16, #tpu.memory_space<vmem>>) attributes {dimension_semantics = [#tpu.dimension_semantics<arbitrary>], iteration_bounds = array<i64: 3>, scalar_prefetch = 0 : i64, scratch_operands = 3 : i64, tpu.core_type = #tpu.core_type<tc>, window_params = [{}, {pipeline_mode = #tpu.pipeline_mode<synchronous>, transform_indices = @transform_1, window_bounds = array<i64: 128, 128>}, {pipeline_mode = #tpu.pipeline_mode<synchronous>, transform_indices = @transform_2, window_bounds = array<i64: 128, 128>}, {transform_indices = @transform_3, window_bounds = array<i64: 1, 128, 128>}, {transform_indices = @transform_4, window_bounds = array<i64: 1, 1, 128>}, {pipeline_mode = #tpu.pipeline_mode<synchronous>, transform_indices = @transform_5, window_bounds = array<i64: 128, 128>}]} {
    %c0_i32 = arith.constant 0 : i32
    %0 = arith.cmpi eq, %arg0, %c0_i32 : i32
    %1 = arith.extui %0 : i1 to i32
    %c0_i32_0 = arith.constant 0 : i32
    %2 = arith.cmpi ne, %1, %c0_i32_0 : i32
    scf.if %2 {
      "tpu.region"() ({
        %26 = tpu.sem_alloc : memref<!tpu.dma_semaphore, #tpu.memory_space<semaphore_mem>>
        tpu.enqueue_dma source(%arg1 : memref<128x128xbf16, #tpu.memory_space<any>>) target(%arg7 : memref<128x128xbf16, #tpu.memory_space<vmem>>) target_semaphore(%26 : memref<!tpu.dma_semaphore, #tpu.memory_space<semaphore_mem>>)
        tpu.wait_dma2 semaphore(%26 : memref<!tpu.dma_semaphore, #tpu.memory_space<semaphore_mem>>) src(%arg1 : memref<128x128xbf16, #tpu.memory_space<any>>) dst(%arg7 : memref<128x128xbf16, #tpu.memory_space<vmem>>)
        tpu.yield
      }) : () -> ()
      %c0_18 = arith.constant 0 : index
      %c0_19 = arith.constant 0 : index
      %22 = vector.load %arg2[%c0_18, %c0_19] : memref<128x128xbf16, #tpu.memory_space<vmem>>, vector<128x128xbf16>
      %c0_20 = arith.constant 0 : index
      %c0_21 = arith.constant 0 : index
      %23 = vector.load %arg3[%c0_20, %c0_21] : memref<128x128xbf16, #tpu.memory_space<vmem>>, vector<128x128xbf16>
      %24 = arith.mulf %22, %23 : vector<128x128xbf16>
      %c0_22 = arith.constant 0 : index
      %c0_23 = arith.constant 0 : index
      %25 = vector.load %arg8[%c0_22, %c0_23] : memref<128x128xbf16, #tpu.memory_space<vmem>>, vector<128x128xbf16>
      tpu.vector_store %arg8[%c0_22, %c0_23], %24 {strides = array<i32>} : memref<128x128xbf16, #tpu.memory_space<vmem>>, vector<128x128xbf16>,
    } else {
    }
    %c0 = arith.constant 0 : index
    %c0_1 = arith.constant 0 : index
    %3 = vector.load %arg8[%c0, %c0_1] : memref<128x128xbf16, #tpu.memory_space<vmem>>, vector<128x128xbf16>
    %c0_2 = arith.constant 0 : index
    %c0_3 = arith.constant 0 : index
    %c0_4 = arith.constant 0 : index
    %4 = vector.load %arg4[%c0_2, %c0_3, %c0_4] : memref<1x128x128xbf16, #tpu.memory_space<vmem>>, vector<1x128x128xbf16>
    %5 = vector.shape_cast %4 : vector<1x128x128xbf16> to vector<128x128xbf16>
    %cst = arith.constant dense<0.000000e+00> : vector<128x128xf32>
    %6 = tpu.matmul %3, %5, %cst {dimension_numbers = #tpu.dot_dimension_numbers<[1], [0], [0], [1], [0, 0, 1, 1], [], []>} : vector<128x128xbf16>, vector<128x128xbf16>, vector<128x128xf32> -> vector<128x128xf32>
    %7 = arith.truncf %6 : vector<128x128xf32> to vector<128x128xbf16>
    %c0_5 = arith.constant 0 : index
    %c0_6 = arith.constant 0 : index
    %8 = vector.load %arg9[%c0_5, %c0_6] : memref<128x128xbf16, #tpu.memory_space<vmem>>, vector<128x128xbf16>
    tpu.vector_store %arg9[%c0_5, %c0_6], %7 {strides = array<i32>} : memref<128x128xbf16, #tpu.memory_space<vmem>>, vector<128x128xbf16>,
    %c0_7 = arith.constant 0 : index
    %c0_8 = arith.constant 0 : index
    %9 = vector.load %arg9[%c0_7, %c0_8] : memref<128x128xbf16, #tpu.memory_space<vmem>>, vector<128x128xbf16>
    %c0_9 = arith.constant 0 : index
    %c0_10 = arith.constant 0 : index
    %c0_11 = arith.constant 0 : index
    %10 = vector.load %arg5[%c0_9, %c0_10, %c0_11] : memref<1x1x128xf32, #tpu.memory_space<vmem>>, vector<1x1x128xf32>
    %11 = vector.shape_cast %10 : vector<1x1x128xf32> to vector<1x128xf32>
    %c0_12 = arith.constant 0 : index
    %c0_13 = arith.constant 0 : index
    %12 = vector.load %arg7[%c0_12, %c0_13] : memref<128x128xbf16, #tpu.memory_space<vmem>>, vector<128x128xbf16>
    %cst_14 = arith.constant dense<0.000000e+00> : vector<128x128xf32>
    %13 = tpu.matmul %12, %9, %cst_14 {dimension_numbers = #tpu.dot_dimension_numbers<[1], [0], [0], [1], [0, 0, 1, 1], [], []>} : vector<128x128xbf16>, vector<128x128xbf16>, vector<128x128xf32> -> vector<128x128xf32>
    %14 = vector.broadcast %11 : vector<1x128xf32> to vector<128x128xf32>
    %15 = arith.addf %13, %14 : vector<128x128xf32>
    %c2_i32 = arith.constant 2 : i32
    %16 = arith.cmpi ne, %arg0, %c2_i32 : i32
    %17 = arith.extui %16 : i1 to i32
    %c0_i32_15 = arith.constant 0 : i32
    %18 = arith.cmpi ne, %17, %c0_i32_15 : i32
    scf.if %18 {
      %22 = arith.truncf %15 : vector<128x128xf32> to vector<128x128xbf16>
      %c0_18 = arith.constant 0 : index
      %c0_19 = arith.constant 0 : index
      %23 = vector.load %arg8[%c0_18, %c0_19] : memref<128x128xbf16, #tpu.memory_space<vmem>>, vector<128x128xbf16>
      tpu.vector_store %arg8[%c0_18, %c0_19], %22 {strides = array<i32>} : memref<128x128xbf16, #tpu.memory_space<vmem>>, vector<128x128xbf16>,
    } else {
    }
    %c2_i32_16 = arith.constant 2 : i32
    %19 = arith.cmpi eq, %arg0, %c2_i32_16 : i32
    %20 = arith.extui %19 : i1 to i32
    %c0_i32_17 = arith.constant 0 : i32
    %21 = arith.cmpi ne, %20, %c0_i32_17 : i32
    scf.if %21 {
      %c0_18 = arith.constant 0 : index
      %c0_19 = arith.constant 0 : index
      %22 = vector.load %arg6[%c0_18, %c0_19] : memref<128x128xf32, #tpu.memory_space<vmem>>, vector<128x128xf32>
      tpu.vector_store %arg6[%c0_18, %c0_19], %15 {strides = array<i32>} : memref<128x128xf32, #tpu.memory_space<vmem>>, vector<128x128xf32>,
    } else {
    }
    return
  }
  func.func @transform_1(%arg0: i32) -> (i32, i32) {
    %c0_i32 = arith.constant 0 : i32
    %c0_i32_0 = arith.constant 0 : i32
    %c0_i32_1 = arith.constant 0 : i32
    return %c0_i32, %c0_i32_0 : i32, i32
  }
  func.func @transform_2(%arg0: i32) -> (i32, i32) {
    %c0_i32 = arith.constant 0 : i32
    %c0_i32_0 = arith.constant 0 : i32
    %c0_i32_1 = arith.constant 0 : i32
    return %c0_i32, %c0_i32_0 : i32, i32
  }
  func.func @transform_3(%arg0: i32) -> (i32, i32, i32) {
    %c0_i32 = arith.constant 0 : i32
    %c0_i32_0 = arith.constant 0 : i32
    %c0_i32_1 = arith.constant 0 : i32
    return %arg0, %c0_i32, %c0_i32_0 : i32, i32, i32
  }
  func.func @transform_4(%arg0: i32) -> (i32, i32, i32) {
    %c0_i32 = arith.constant 0 : i32
    %c0_i32_0 = arith.constant 0 : i32
    %c0_i32_1 = arith.constant 0 : i32
    return %arg0, %c0_i32, %c0_i32_0 : i32, i32, i32
  }
  func.func @transform_5(%arg0: i32) -> (i32, i32) {
    %c0_i32 = arith.constant 0 : i32
    %c0_i32_0 = arith.constant 0 : i32
    %c0_i32_1 = arith.constant 0 : i32
    return %c0_i32, %c0_i32_0 : i32, i32
  }
}

</mosaic_0001>

<bundles_post_ra>
// kernel: tpu_custom_call.1
= control target key start
LH: loop header
LB: loop body
LE: loop exit
PB: predicated region body
PF: predicated region fallthrough
CT: control target
= control target key end

     0   :  { %10 = vsyncpa [#allocation6], 0  ;;  %s1798_s0 = inlined_call_operand.hbm [shape: bf16[128,128], index: 0, kind: input, shape index: {}]   ;;  %s1799_s1 = inlined_call_operand.hbm [shape: bf16[128,128], index: 1, kind: input, shape index: {}]   ;;  %s1800_s2 = inlined_call_operand.hbm [shape: bf16[128,128], index: 2, kind: input, shape index: {}]   ;;  %s1801_s3 = inlined_call_operand.hbm [shape: bf16[3,128,128], index: 3, kind: input, shape index: {}]   ;;  %s1802_s4 = inlined_call_operand.vmem [shape: f32[3,1,128], index: 4, kind: input, shape index: {}]   ;;  %s1803_s5 = inlined_call_operand.hbm [shape: f32[128,128], index: 5, kind: output, shape index: {}]  }
   0x1   :  { %11 = vsyncpa [#allocation9], 0 }
   0x2   :  { %12 = vsyncpa [#allocation7], 0  ;;  %s1638_s18 = smov 0   ;;  %s1640_s19 = smov 0  }
   0x3   :  { %s1642_s20 = smov 0   ;;  %s1644_s21 = smov 0  }
   0x4 LB: > { %s1657_s22 = sadd.s32 4294967295, %s1598_s21   ;;  %p80_p0 = scmp.ne.s32.totalorder %s1590_s19, %s1586_s18  ;;  %s1598_s21 = sphi %s1644_s21, %s1810_s21   ;;  %s1594_s20 = sphi %s1642_s20, %s1809_s20   ;;  %s1590_s19 = sphi %s1640_s19, %s1808_s19   ;;  %s1586_s18 = sphi %s1638_s18, %s1807_s18  }
   0x5   : > { %p81_p1 = scmp.eq.s32.totalorder %s1657_s22, 0  ;;  %p921_p2 = scmp.ge.s32.totalorder %s1598_s21, 1 }
   0x6   : > { %p138_p3 = scmp.lt.s32.totalorder %s1598_s21, 4  ;;  %p922_p4 = scmp.ne.s32.totalorder %s1657_s22, 0 }
   0x7   : > { %p1666_p5 = por %p81_p1, %p80_p0  ;;  %s149_s26 = sshll.u32 %s1799_s1, 4  ;;  %s150_s26 = int_to_ptr.hbm [resolvable:$true] %s149_s26 }
   0x8   : > { %p1673_p6 = pnand %p921_p2, %p138_p3  ;;  %s1600_s28 = smov [#allocation5]  }
   0x9   : > { %s151_s29 = sshll.u32 %s1600_s28, 4  ;;  %s163_s7 = sshll.u32 %s1800_s2, 4  ;;  %s152_s29 = int_to_ptr.vmem [resolvable:$true] %s151_s29  ;;  %s164_s7 = int_to_ptr.hbm [resolvable:$true] %s163_s7 }
   0xa   : > { %p1349_p7 = pneg %p1673_p6  ;;  %s1601_s8 = smov 64  }
   0xb   : > { %s1602_s9 = smov 4   ;;  %s1603_s10 = smov [#allocation8]  }
   0xc   : > { %p1350_p8 = pnand %p1349_p7, %p81_p1  ;;  %s165_s11 = sshll.u32 %s1603_s10, 4  ;;  %s166_s11 = int_to_ptr.vmem [resolvable:$true] %s165_s11 }
   0xd   : > { %s1691_s12 = sadd.s32 1, %s1598_s21   ;;  %s67_s13 = sadd.s32 1, %s1594_s20 }
   0xe   : > { %1352 = dma.hbm_to_vmem [thread:$0]  (!%p1350_p8), %s150_s26, 1024, %s152_s29, [#allocation6], %s1601_s8, %s1601_s8, %s1602_s9  }
   0xf   : > { %1355 = dma.hbm_to_vmem [thread:$0]  (!%p1350_p8), %s164_s7, 1024, %s166_s11, [#allocation9], %s1601_s8, %s1601_s8, %s1602_s9  }
  0x10   : > { %s64_s14 = ssub.s32 %s1598_s21, %s1691_s12  ;;  %p74_p9 = scmp.ne.s32.totalorder %s1594_s20, %s1590_s19 }
  0x11   : > { %p65_p10 = scmp.eq.s32.totalorder %s64_s14, 0  ;;  %p75_p11 = scmp.eq.s32.totalorder %s1598_s21, 0 }
  0x12   : > { %p1362_p12 = scmp.lt.s32.totalorder %s1598_s21, 3  ;;  %s179_s15 = sand.u32 1, %s1598_s21  }
  0x13   : > { %s1702_s16 = scalar_select %p65_p10, %s1594_s20, %s67_s13  }
  0x14   : > { %p76_p13 = por %p75_p11, %p74_p9  ;;  %s181_s17 = sand.u32 1, %s1594_s20  }
  0x15   : > { %s1067_s18 = sshll.u32 %s1598_s21, 6  ;;  %s925_s24 = sshll.u32 %s181_s17, 6 }
  0x16   : > { %s188_s28 = scalar_lea.hbm %s1801_s3, %s1067_s18  ;;  %s183_s30 = scalar_lea.vmem [#allocation10], %s925_s24 }
  0x17   : > { %s189_s29 = sshll.u32 %s188_s28, 4  ;;  %s191_s6 = sshll.u32 %s183_s30, 4  ;;  %s190_s29 = int_to_ptr.hbm [resolvable:$true] %s189_s29  ;;  %s192_s6 = int_to_ptr.vmem [resolvable:$true] %s191_s6 }
  0x18   : > { %p1711_p0 = pnand %p1362_p12, %p76_p13  ;;  %s180_s10 = scalar_lea.sflag [#allocation6], %s179_s15 }
  0x19   : > { %s1468_s11 = sshra.s32 %s190_s29, 4  ;;  %s1475_s18 = scalar_lea.hbm %s1801_s3, 192  ;;  %s1469_s11 = int_to_ptr.hbm [resolvable:$true] %s1468_s11 }
  0x1a   : > { %s1470_s13 = scalar_lea.hbm %s1469_s11, 64  ;;  %p1472_p3 = pneg %p1711_p0 }
  0x1b   : > { %p1471_p2 = scmp.ne.s32.totalorder %s1469_s11, %s1470_s13  ;;  %p1476_p9 = scmp.lt.s32.totalorder %s1469_s11, %s1801_s3 }
  0x1c   : > { %p1477_p10 = scmp.lt.s32.totalorder %s1475_s18, %s1470_s13 }
  0x1d   : > { %p1473_p7 = pnand %p1472_p3, %p1471_p2 }
  0x1e   : > { %p1478_p11 = por %p1477_p10, %p1476_p9 }
  0x1f   : > { %p1474_p8 = pneg %p1473_p7 }
  0x21   : > { %p1479_p12 = pnand %p1478_p11, %p1474_p8 }
  0x23   : > { %1482 = shalt.err (!%p1479_p12)
}
  0x24   : > { %1359 = dma.hbm_to_vmem [thread:$0]  (!%p1711_p0), %s190_s29, 1024, %s192_s6, %s180_s10, %s1601_s8, %s1601_s8, %s1602_s9  }
  0x25   : > { %209 = sbr.rel (%p1673_p6) target bundleno = 567 (0x237), region = 36 }
  0x2a   : > { %1567 = dma.done.wait (%p81_p1), [#allocation6], 1024  }
  0x2b   : > { %1569 = vsyncadd (%p81_p1), [#allocation6], 4294966272 }
  0x2c   : > { %1571 = dma.done.wait (%p81_p1), [#allocation9], 1024  }
  0x2d   : > { %1573 = vsyncadd (%p81_p1), [#allocation9], 4294966272  ;;  %s221_s15 = sand.u32 1, %s1657_s22   ;;  %s223_s8 = sand.u32 1, %s1590_s19  }
  0x2e   : > { %s931_s9 = sshll.u32 %s223_s8, 6  ;;  %s222_s27 = scalar_lea.sflag [#allocation6], %s221_s15 }
  0x2f   : > { %s1740_s25 = scalar_lea.vmem [#allocation10], %s931_s9 }
  0x30   : > { %1575 = dma.done.wait (%p1666_p5), %s222_s27, 1024  }
  0x31   : > { %1577 = vsyncadd (%p1666_p5), %s222_s27, 4294966272  ;;  %p249_p6 = scmp.lt.s32.totalorder %s1657_s22, 2  ;;  %255 = sbr.rel (%p922_p4) target bundleno = 78 (0x4e), region = 52 }
  0x33   : > { %s1748_s26 = scalar_select %p249_p6, %s1657_s22, 2 }
  0x35   : > { %s251_s30 = scalar_lea.vmem %s1802_s4, %s1748_s26 }
  0x36   : > { %s263_s10 = sshll.u32 %s1798_s0, 4  ;;  %s1604_s23 = smov [#allocation2]   ;;  %s264_s10 = int_to_ptr.hbm [resolvable:$true] %s263_s10 }
  0x37   : > { %s265_s11 = sshll.u32 %s1604_s23, 4  ;;  %s266_s11 = int_to_ptr.vmem [resolvable:$true] %s265_s11 }
  0x38   : > { %268 = dma.hbm_to_vmem [thread:$0]  %s264_s10, 1024, %s266_s11, [#allocation12] }
  0x39   : > { %1578 = dma.done.wait [#allocation12], 1024 }
  0x3a   : > { %1579 = vsyncadd [#allocation12], 4294966272  ;;  %v1101_v0 = vld [vmem:[#allocation5] sm:$0xff]   ;;  %v1284_v2 = vld [vmem:[#allocation5 + $0x8] sm:$0xff]  }
  0x3b   : > { %v1133_v1 = vld [vmem:[#allocation8] sm:$0xff]   ;;  %v1102_v3 = vunpack.c.l.bf16 %v1101_v0  ;;  %v1103_v4 = vunpack.c.h.bf16 %v1101_v0  ;;  %v1291_v7 = vld [vmem:[#allocation8 + $0x8] sm:$0xff]   ;;  %v1285_v8 = vld [vmem:[#allocation5 + $0x10] sm:$0xff]   ;;  %v1106_v10 = vunpack.c.l.bf16 %v1284_v2  ;;  %v1107_v11 = vunpack.c.h.bf16 %v1284_v2 }
  0x3c   : > { %v1134_v5 = vunpack.c.l.bf16 %v1133_v1  ;;  %v1135_v6 = vunpack.c.h.bf16 %v1133_v1  ;;  %v1292_v9 = vld [vmem:[#allocation8 + $0x10] sm:$0xff]   ;;  %v1138_v12 = vunpack.c.l.bf16 %v1291_v7  ;;  %v1139_v13 = vunpack.c.h.bf16 %v1291_v7  ;;  %v1286_v14 = vld [vmem:[#allocation5 + $0x18] sm:$0xff]   ;;  %v1287_v24 = vld [vmem:[#allocation5 + $0x20] sm:$0xff]  }
  0x3d   : > { %v1293_v15 = vld [vmem:[#allocation8 + $0x18] sm:$0xff]   ;;  %v1110_v18 = vunpack.c.l.bf16 %v1285_v8  ;;  %v1111_v19 = vunpack.c.h.bf16 %v1285_v8  ;;  %v1142_v22 = vunpack.c.l.bf16 %v1292_v9  ;;  %v1143_v23 = vunpack.c.h.bf16 %v1292_v9  ;;  %v1294_v25 = vld [vmem:[#allocation8 + $0x20] sm:$0xff]   ;;  %v1288_v30 = vld [vmem:[#allocation5 + $0x28] sm:$0xff]  }
  0x3e   : > { %v337_v16 = vmul.f32 %v1134_v5, %v1102_v3  ;;  %v338_v17 = vmul.f32 %v1135_v6, %v1103_v4  ;;  %v339_v20 = vmul.f32 %v1138_v12, %v1106_v10  ;;  %v340_v21 = vmul.f32 %v1139_v13, %v1107_v11  ;;  %v1295_v35 = vld [vmem:[#allocation8 + $0x28] sm:$0xff]   ;;  %v1289_v40 = vld [vmem:[#allocation5 + $0x30] sm:$0xff]   ;;  %v1290_v50 = vld [vmem:[#allocation5 + $0x38] sm:$0xff]  }
  0x3f   : > { %v1114_v27 = vunpack.c.l.bf16 %v1286_v14  ;;  %v1115_v28 = vunpack.c.h.bf16 %v1286_v14  ;;  %v1146_v29 = vunpack.c.l.bf16 %v1293_v15  ;;  %v341_v32 = vmul.f32 %v1142_v22, %v1110_v18  ;;  %v1296_v45 = vld [vmem:[#allocation8 + $0x30] sm:$0xff]   ;;  %v1297_v51 = vld [vmem:[#allocation8 + $0x38] sm:$0xff]  }
  0x40   : > { %v1167_v26 = vpack.c.bf16 %v338_v17, %v337_v16  ;;  %v1172_v31 = vpack.c.bf16 %v340_v21, %v339_v20  ;;  %v342_v33 = vmul.f32 %v1143_v23, %v1111_v19  ;;  %v1147_v34 = vunpack.c.h.bf16 %v1293_v15 }
  0x41   : > { %v343_v36 = vmul.f32 %v1146_v29, %v1114_v27  ;;  %v1118_v37 = vunpack.c.l.bf16 %v1287_v24  ;;  %v1119_v38 = vunpack.c.h.bf16 %v1287_v24  ;;  %v1150_v39 = vunpack.c.l.bf16 %v1294_v25 }
  0x42   : > { %1168 = vst [vmem:[#allocation3 + $0x30] sm:$0xff] %v1167_v26   ;;  %v1177_v41 = vpack.c.bf16 %v342_v33, %v341_v32  ;;  %v344_v42 = vmul.f32 %v1147_v34, %v1115_v28  ;;  %v1151_v43 = vunpack.c.h.bf16 %v1294_v25  ;;  %v1122_v44 = vunpack.c.l.bf16 %v1288_v30 }
  0x43   : > { %1298 = vst [vmem:[#allocation3] sm:$0xff] %v1172_v31   ;;  %v345_v46 = vmul.f32 %v1150_v39, %v1118_v37  ;;  %v1123_v47 = vunpack.c.h.bf16 %v1288_v30  ;;  %v1154_v48 = vunpack.c.l.bf16 %v1295_v35  ;;  %v1155_v49 = vunpack.c.h.bf16 %v1295_v35 }
  0x44   : > { %1299 = vst [vmem:[#allocation3 + $0x18] sm:$0xff] %v1177_v41   ;;  %v1182_v52 = vpack.c.bf16 %v344_v42, %v343_v36  ;;  %v346_v53 = vmul.f32 %v1151_v43, %v1119_v38  ;;  %v1126_v54 = vunpack.c.l.bf16 %v1289_v40  ;;  %v1127_v55 = vunpack.c.h.bf16 %v1289_v40 }
  0x45   : > { %v347_v56 = vmul.f32 %v1154_v48, %v1122_v44  ;;  %v348_v57 = vmul.f32 %v1155_v49, %v1123_v47  ;;  %v1158_v58 = vunpack.c.l.bf16 %v1296_v45  ;;  %v1159_v59 = vunpack.c.h.bf16 %v1296_v45 }
  0x46   : > { %1300 = vst [vmem:[#allocation3 + $0x10] sm:$0xff] %v1182_v52   ;;  %v1187_v60 = vpack.c.bf16 %v346_v53, %v345_v46  ;;  %v1130_v61 = vunpack.c.l.bf16 %v1290_v50  ;;  %v1131_v62 = vunpack.c.h.bf16 %v1290_v50  ;;  %v1162_v63 = vunpack.c.l.bf16 %v1297_v51 }
  0x47   : > { %v1192_v0 = vpack.c.bf16 %v348_v57, %v347_v56  ;;  %v349_v1 = vmul.f32 %v1158_v58, %v1126_v54  ;;  %v350_v2 = vmul.f32 %v1159_v59, %v1127_v55  ;;  %v1163_v3 = vunpack.c.h.bf16 %v1297_v51 }
  0x48   : > { %1301 = vst [vmem:[#allocation3 + $0x8] sm:$0xff] %v1187_v60   ;;  %v351_v4 = vmul.f32 %v1162_v63, %v1130_v61 }
  0x49   : > { %1302 = vst [vmem:[#allocation3 + $0x20] sm:$0xff] %v1192_v0   ;;  %v1197_v5 = vpack.c.bf16 %v350_v2, %v349_v1  ;;  %v352_v6 = vmul.f32 %v1163_v3, %v1131_v62 }
  0x4b   : > { %1303 = vst [vmem:[#allocation3 + $0x28] sm:$0xff] %v1197_v5   ;;  %v1202_v7 = vpack.c.bf16 %v352_v6, %v351_v4 }
  0x4d   : > { %1304 = vst [vmem:[#allocation3 + $0x38] sm:$0xff] %v1202_v7  }
  0x4e PF: > { %v1083_v8 = vld [vmem:[%s1740_s25 + $0x38] sm:$0xff]  ;;  %v1082_v9 = vld [vmem:[%s1740_s25 + $0x30] sm:$0xff]  ;;  %v1081_v10 = vld [vmem:[%s1740_s25 + $0x28] sm:$0xff]  ;;  %p1061_p1 = scmp.eq.s32.totalorder %s1657_s22, 2 }
  0x4f   : > { %1319 = vmatpush.bf16.msra.mxu2 %v1083_v8  ;;  %513 = vmatpush.bf16.msra.mxu0 %v1083_v8  ;;  %v1080_v11 = vld [vmem:[%s1740_s25 + $0x20] sm:$0xff]  ;;  %v1079_v12 = vld [vmem:[%s1740_s25 + $0x18] sm:$0xff]  ;;  %v1078_v13 = vld [vmem:[%s1740_s25 + $0x10] sm:$0xff] }
  0x50   : > { %v1077_v14 = vld [vmem:[%s1740_s25 + $0x8] sm:$0xff]  ;;  %v1076_v15 = vld [vmem:[%s1740_s25] sm:$0xff]  ;;  %v1068_v17 = vld [vmem:[#allocation3 + $0x30] sm:$0xff] }
  0x51   : > { %v1072_v16 = vld [vmem:[#allocation3 + $0x8] sm:$0xff]  ;;  %v1073_v18 = vld [vmem:[#allocation3 + $0x20] sm:$0xff]  ;;  %v1070_v21 = vld [vmem:[#allocation3 + $0x18] sm:$0xff] }
  0x52   : > { %v1069_v19 = vld [vmem:[#allocation3] sm:$0xff]  ;;  %v1074_v20 = vld [vmem:[#allocation3 + $0x28] sm:$0xff]  ;;  %v1071_v23 = vld [vmem:[#allocation3 + $0x10] sm:$0xff] }
  0x53   : > { %1320 = vmatpush.bf16.msra.mxu2 %v1082_v9  ;;  %514 = vmatpush.bf16.msra.mxu0 %v1082_v9  ;;  %v1092_v56 = vld [vmem:[#allocation2] sm:$0xff]  ;;  %v1093_v58 = vld [vmem:[#allocation2 + $0x8] sm:$0xff]  ;;  %v1094_v60 = vld [vmem:[#allocation2 + $0x10] sm:$0xff] }
  0x54   : > { %v1075_v22 = vld [vmem:[#allocation3 + $0x38] sm:$0xff]  ;;  %v1096_v57 = vld [vmem:[#allocation2 + $0x20] sm:$0xff]  ;;  %v1097_v59 = vld [vmem:[#allocation2 + $0x28] sm:$0xff] }
  0x55   : > { %v1098_v61 = vld [vmem:[#allocation2 + $0x30] sm:$0xff]  ;;  %v1095_v62 = vld [vmem:[#allocation2 + $0x18] sm:$0xff]  ;;  %v1407_v0 = vld [vmem:[%s251_s30] ss:$0 sm:$0xff] }
  0x56   : > { %v1099_v63 = vld [vmem:[#allocation2 + $0x38] sm:$0xff] }
  0x57   : > { %1321 = vmatpush.bf16.msra.mxu2 %v1081_v10  ;;  %515 = vmatpush.bf16.msra.mxu0 %v1081_v10 }
  0x5b   : > { %1322 = vmatpush.bf16.msra.mxu2 %v1080_v11  ;;  %516 = vmatpush.bf16.msra.mxu0 %v1080_v11 }
  0x5f   : > { %1323 = vmatpush.bf16.msra.mxu2 %v1079_v12  ;;  %517 = vmatpush.bf16.msra.mxu0 %v1079_v12 }
  0x63   : > { %1324 = vmatpush.bf16.msra.mxu2 %v1078_v13  ;;  %518 = vmatpush.bf16.msra.mxu0 %v1078_v13 }
  0x67   : > { %1325 = vmatpush.bf16.msra.mxu2 %v1077_v14  ;;  %519 = vmatpush.bf16.msra.mxu0 %v1077_v14 }
  0x6b   : > { %1326 = vmatpush.bf16.msra.mxu2 %v1076_v15  ;;  %520 = vmatpush.bf16.msra.mxu0 %v1076_v15 }
  0x6e   : > { %541 = vmatmul.bf16.vlgmr.msra.gmra.mxu2 %v1072_v16  ;;  %521 = vmatmul.bf16.vlgmr.msra.gmra.mxu0 %v1068_v17 }
  0x7e   : > { %546 = vmatmul.bf16.gmra.mxu2 %v1073_v18  ;;  %526 = vmatmul.bf16.gmra.mxu0 %v1069_v19 }
  0x8e   : > { %551 = vmatmul.bf16.gmra.mxu2 %v1074_v20  ;;  %531 = vmatmul.bf16.gmra.mxu0 %v1070_v21 }
  0x9e   : > { %556 = vmatmul.bf16.gmra.mxu2 %v1075_v22  ;;  %536 = vmatmul.bf16.gmra.mxu0 %v1071_v23 }
  0xeb   : > { %v522_v24 = vpop.f32.mrf.mxu0 }
  0xf1   : > { %v542_v25 = vpop.f32.mrf.mxu2 }
  0xf3   : > { %v524_v26 = vpop.f32.mrf.mxu0 }
  0xf4   : > { %v1207_v27 = vpack.c.bf16 %v524_v26, %v522_v24 }
  0xf6   : > { %1208 = vst [vmem:[#allocation4] sm:$0xff] %v1207_v27  }
  0xf9   : > { %v544_v28 = vpop.f32.mrf.mxu2 }
  0xfa   : > { %v1227_v29 = vpack.c.bf16 %v544_v28, %v542_v25 }
  0xfb   : > { %v527_v30 = vpop.f32.mrf.mxu0 }
  0xfc   : > { %1308 = vst [vmem:[#allocation4 + $0x28] sm:$0xff] %v1227_v29  }
  0xfd   : > { %v1084_v55 = vld [vmem:[#allocation4] sm:$0xff] }
 0x101   : > { %v547_v31 = vpop.f32.mrf.mxu2 }
 0x103   : > { %v529_v32 = vpop.f32.mrf.mxu0  ;;  %v1088_v51 = vld [vmem:[#allocation4 + $0x28] sm:$0xff] }
 0x104   : > { %v1212_v33 = vpack.c.bf16 %v529_v32, %v527_v30 }
 0x106   : > { %1305 = vst [vmem:[#allocation4 + $0x18] sm:$0xff] %v1212_v33  }
 0x109   : > { %v549_v34 = vpop.f32.mrf.mxu2 }
 0x10a   : > { %v1232_v35 = vpack.c.bf16 %v549_v34, %v547_v31 }
 0x10b   : > { %v532_v36 = vpop.f32.mrf.mxu0 }
 0x10c   : > { %1309 = vst [vmem:[#allocation4 + $0x8] sm:$0xff] %v1232_v35  }
 0x10d   : > { %v1085_v54 = vld [vmem:[#allocation4 + $0x18] sm:$0xff] }
 0x111   : > { %v552_v37 = vpop.f32.mrf.mxu2 }
 0x113   : > { %v534_v38 = vpop.f32.mrf.mxu0  ;;  %v1089_v50 = vld [vmem:[#allocation4 + $0x8] sm:$0xff] }
 0x114   : > { %v1217_v39 = vpack.c.bf16 %v534_v38, %v532_v36 }
 0x116   : > { %1306 = vst [vmem:[#allocation4 + $0x10] sm:$0xff] %v1217_v39  }
 0x119   : > { %v554_v40 = vpop.f32.mrf.mxu2 }
 0x11a   : > { %v1237_v41 = vpack.c.bf16 %v554_v40, %v552_v37 }
 0x11b   : > { %v537_v42 = vpop.f32.mrf.mxu0 }
 0x11c   : > { %1310 = vst [vmem:[#allocation4 + $0x30] sm:$0xff] %v1237_v41  }
 0x11d   : > { %v1086_v53 = vld [vmem:[#allocation4 + $0x10] sm:$0xff] }
 0x121   : > { %v557_v43 = vpop.f32.mrf.mxu2 }
 0x123   : > { %v539_v44 = vpop.f32.mrf.mxu0  ;;  %v1090_v49 = vld [vmem:[#allocation4 + $0x30] sm:$0xff] }
 0x124   : > { %v1222_v45 = vpack.c.bf16 %v539_v44, %v537_v42 }
 0x126   : > { %1307 = vst [vmem:[#allocation4 + $0x20] sm:$0xff] %v1222_v45  }
 0x129   : > { %v559_v46 = vpop.f32.mrf.mxu2 }
 0x12a   : > { %v1242_v47 = vpack.c.bf16 %v559_v46, %v557_v43 }
 0x12c   : > { %1311 = vst [vmem:[#allocation4 + $0x38] sm:$0xff] %v1242_v47  }
 0x12d   : > { %v1087_v52 = vld [vmem:[#allocation4 + $0x20] sm:$0xff] }
 0x133   : > { %v1091_v48 = vld [vmem:[#allocation4 + $0x38] sm:$0xff] }
 0x134   : > { %726 = vmatpush.bf16.msra.mxu1 %v1091_v48  ;;  %1327 = vmatpush.bf16.msra.mxu3 %v1091_v48 }
 0x138   : > { %727 = vmatpush.bf16.msra.mxu1 %v1090_v49  ;;  %1328 = vmatpush.bf16.msra.mxu3 %v1090_v49 }
 0x13c   : > { %728 = vmatpush.bf16.msra.mxu1 %v1089_v50  ;;  %1329 = vmatpush.bf16.msra.mxu3 %v1089_v50 }
 0x140   : > { %729 = vmatpush.bf16.msra.mxu1 %v1088_v51  ;;  %1330 = vmatpush.bf16.msra.mxu3 %v1088_v51 }
 0x144   : > { %730 = vmatpush.bf16.msra.mxu1 %v1087_v52  ;;  %1331 = vmatpush.bf16.msra.mxu3 %v1087_v52 }
 0x148   : > { %731 = vmatpush.bf16.msra.mxu1 %v1086_v53  ;;  %1332 = vmatpush.bf16.msra.mxu3 %v1086_v53 }
 0x14c   : > { %732 = vmatpush.bf16.msra.mxu1 %v1085_v54  ;;  %1333 = vmatpush.bf16.msra.mxu3 %v1085_v54 }
 0x150   : > { %733 = vmatpush.bf16.msra.mxu1 %v1084_v55  ;;  %1334 = vmatpush.bf16.msra.mxu3 %v1084_v55 }
 0x153   : > { %734 = vmatmul.bf16.vlgmr.msra.gmra.mxu1 %v1092_v56  ;;  %754 = vmatmul.bf16.vlgmr.msra.gmra.mxu3 %v1096_v57 }
 0x163   : > { %739 = vmatmul.bf16.gmra.mxu1 %v1093_v58  ;;  %759 = vmatmul.bf16.gmra.mxu3 %v1097_v59 }
 0x173   : > { %744 = vmatmul.bf16.gmra.mxu1 %v1094_v60  ;;  %764 = vmatmul.bf16.gmra.mxu3 %v1098_v61 }
 0x183   : > { %749 = vmatmul.bf16.gmra.mxu1 %v1095_v62  ;;  %769 = vmatmul.bf16.gmra.mxu3 %v1099_v63 }
 0x1d0   : > { %v735_v1 = vpop.f32.mrf.mxu1 }
 0x1d1   : > { %v736_v2 = vadd.f32 %v1407_v0, %v735_v1 }
 0x1d6   : > { %v755_v3 = vpop.f32.mrf.mxu3 }
 0x1d7   : > { %v756_v4 = vadd.f32 %v1407_v0, %v755_v3 }
 0x1d8   : > { %v737_v5 = vpop.f32.mrf.mxu1 }
 0x1d9   : > { %v738_v6 = vadd.f32 %v1407_v0, %v737_v5 }
 0x1de   : > { %v757_v7 = vpop.f32.mrf.mxu3 }
 0x1df   : > { %v758_v8 = vadd.f32 %v1407_v0, %v757_v7 }
 0x1e0   : > { %v740_v9 = vpop.f32.mrf.mxu1 }
 0x1e1   : > { %v741_v10 = vadd.f32 %v1407_v0, %v740_v9 }
 0x1e6   : > { %v760_v11 = vpop.f32.mrf.mxu3 }
 0x1e7   : > { %v761_v12 = vadd.f32 %v1407_v0, %v760_v11 }
 0x1e8   : > { %v742_v13 = vpop.f32.mrf.mxu1 }
 0x1e9   : > { %v743_v14 = vadd.f32 %v1407_v0, %v742_v13 }
 0x1ee   : > { %v762_v15 = vpop.f32.mrf.mxu3 }
 0x1ef   : > { %v763_v16 = vadd.f32 %v1407_v0, %v762_v15 }
 0x1f0   : > { %v745_v17 = vpop.f32.mrf.mxu1 }
 0x1f1   : > { %v746_v18 = vadd.f32 %v1407_v0, %v745_v17 }
 0x1f6   : > { %v765_v19 = vpop.f32.mrf.mxu3 }
 0x1f7   : > { %v766_v20 = vadd.f32 %v1407_v0, %v765_v19 }
 0x1f8   : > { %v747_v21 = vpop.f32.mrf.mxu1 }
 0x1f9   : > { %v748_v22 = vadd.f32 %v1407_v0, %v747_v21 }
 0x1fe   : > { %v767_v23 = vpop.f32.mrf.mxu3 }
 0x1ff   : > { %v768_v24 = vadd.f32 %v1407_v0, %v767_v23 }
 0x200   : > { %v750_v25 = vpop.f32.mrf.mxu1 }
 0x201   : > { %v751_v26 = vadd.f32 %v1407_v0, %v750_v25 }
 0x206   : > { %v770_v27 = vpop.f32.mrf.mxu3 }
 0x207   : > { %v771_v28 = vadd.f32 %v1407_v0, %v770_v27 }
 0x208   : > { %v752_v29 = vpop.f32.mrf.mxu1 }
 0x209   : > { %v753_v30 = vadd.f32 %v1407_v0, %v752_v29 }
 0x20b   : > { %778 = sbr.rel (%p1061_p1) target bundleno = 538 (0x21a), region = 61 }
 0x20e   : > { %v772_v31 = vpop.f32.mrf.mxu3 }
 0x20f   : > { %v773_v32 = vadd.f32 %v1407_v0, %v772_v31 }
 0x210   : > { %v1247_v33 = vpack.c.bf16 %v738_v6, %v736_v2  ;;  %v1252_v34 = vpack.c.bf16 %v743_v14, %v741_v10  ;;  %v1257_v35 = vpack.c.bf16 %v748_v22, %v746_v18  ;;  %v1262_v36 = vpack.c.bf16 %v753_v30, %v751_v26 }
 0x211   : > { %v1267_v37 = vpack.c.bf16 %v758_v8, %v756_v4  ;;  %v1272_v38 = vpack.c.bf16 %v763_v16, %v761_v12  ;;  %v1277_v39 = vpack.c.bf16 %v768_v24, %v766_v20  ;;  %v1282_v40 = vpack.c.bf16 %v773_v32, %v771_v28 }
 0x212   : > { %1248 = vst [vmem:[#allocation3 + $0x30] sm:$0xff] %v1247_v33  }
 0x213   : > { %1312 = vst [vmem:[#allocation3] sm:$0xff] %v1252_v34  }
 0x214   : > { %1313 = vst [vmem:[#allocation3 + $0x18] sm:$0xff] %v1257_v35  }
 0x215   : > { %1314 = vst [vmem:[#allocation3 + $0x10] sm:$0xff] %v1262_v36  }
 0x216   : > { %1315 = vst [vmem:[#allocation3 + $0x8] sm:$0xff] %v1267_v37  }
 0x217   : > { %1316 = vst [vmem:[#allocation3 + $0x20] sm:$0xff] %v1272_v38  }
 0x218   : > { %1317 = vst [vmem:[#allocation3 + $0x28] sm:$0xff] %v1277_v39  }
 0x219   : > { %1318 = vst [vmem:[#allocation3 + $0x38] sm:$0xff] %v1282_v40  }
 0x21a PF: > { %p1062_p4 = scmp.ne.s32.totalorder %s1657_s22, 2 }
 0x21c   : > { %814 = sbr.rel (%p1062_p4) target bundleno = 561 (0x231), region = 65 }
 0x221   : > { %815 = vst [vmem:[#allocation11] sm:$0xff] %v736_v2 }
 0x222   : > { %816 = vst [vmem:[#allocation11 + $0x8] sm:$0xff] %v738_v6 }
 0x223   : > { %817 = vst [vmem:[#allocation11 + $0x10] sm:$0xff] %v741_v10 }
 0x224   : > { %818 = vst [vmem:[#allocation11 + $0x18] sm:$0xff] %v743_v14 }
 0x225   : > { %819 = vst [vmem:[#allocation11 + $0x20] sm:$0xff] %v746_v18 }
 0x226   : > { %820 = vst [vmem:[#allocation11 + $0x28] sm:$0xff] %v748_v22 }
 0x227   : > { %821 = vst [vmem:[#allocation11 + $0x30] sm:$0xff] %v751_v26 }
 0x228   : > { %822 = vst [vmem:[#allocation11 + $0x38] sm:$0xff] %v753_v30 }
 0x229   : > { %823 = vst [vmem:[#allocation11 + $0x40] sm:$0xff] %v756_v4 }
 0x22a   : > { %824 = vst [vmem:[#allocation11 + $0x48] sm:$0xff] %v758_v8 }
 0x22b   : > { %825 = vst [vmem:[#allocation11 + $0x50] sm:$0xff] %v761_v12 }
 0x22c   : > { %826 = vst [vmem:[#allocation11 + $0x58] sm:$0xff] %v763_v16 }
 0x22d   : > { %827 = vst [vmem:[#allocation11 + $0x60] sm:$0xff] %v766_v20 }
 0x22e   : > { %828 = vst [vmem:[#allocation11 + $0x68] sm:$0xff] %v768_v24 }
 0x22f   : > { %829 = vst [vmem:[#allocation11 + $0x70] sm:$0xff] %v771_v28 }
 0x230   : > { %830 = vst [vmem:[#allocation11 + $0x78] sm:$0xff] %v773_v32 }
 0x231 PF: > { %s838_s24 = sshll.u32 %s1803_s5, 4  ;;  %s1605_s21 = smov [#allocation11]   ;;  %s839_s24 = int_to_ptr.hbm [resolvable:$true] %s838_s24 }
 0x232   : > { %s836_s15 = sshll.u32 %s1605_s21, 4  ;;  %s1606_s8 = smov 128   ;;  %s837_s15 = int_to_ptr.vmem [resolvable:$true] %s836_s15 }
 0x233   : > { %s1607_s9 = smov 8  }
 0x234   : > { %1346 = dma.vmem_to_hbm [thread:$0]  (%p1061_p1), %s837_s15, 2048, %s839_s24, [#allocation7], %s1606_s8, %s1606_s8, %s1607_s9  }
 0x235   : > { %1581 = dma.done.wait (%p1061_p1), [#allocation7], 2048  }
 0x236   : > { %1583 = vsyncadd (%p1061_p1), [#allocation7], 4294965248 }
 0x237 PF: > { %p15_p5 = scmp.ge.s32.totalorder %s1691_s12, 5   ;;  %s1807_s18 = smov %s1590_s19 }
 0x238   : > { %s1808_s19 = smov %s1594_s20  ;;  %s1809_s20 = smov %s1702_s16 }
 0x239   : > { %s1810_s21 = smov %s1691_s12  ;;  %17 = sbr.rel (!%p15_p5) target bundleno = 4 (0x4), region = 100 }
 0x23e   :  { %855 = vsyncpa [#allocation6], 1 }
 0x23f   :  { %857 = vsyncpa [#allocation6 + $0x1], 1 }
 0x240   :  { %858 = vsyncpa [#allocation9], 1 }
 0x241   :  { %859 = vsyncpa [#allocation7], 1 }
 0x242   :  { %861 = vsyncpa [#allocation7 + $0x1], 1 }

</bundles_post_ra>
